<compile_context>
chip_gen: v6e
topology: v6e:2x2x1
jax: 0.10.0
libtpu: 0.0.40
codegen_flags: <defaults>
</compile_context>

<pallas_src>
import functools

import jax
import jax.numpy as jnp
from jax import lax
from jax.experimental import pallas as pl
from jax.experimental.pallas import tpu as pltpu


# ------------------------------ fused kernel ------------------------------

def _mhsa_kernel(x_ref, wqkv_ref, bqkv_ref, wproj_ref, bproj_ref, o_ref,
                 qkv_ref, attn_ref, *, num_heads):
    """One grid step == one batch element.

    x_ref:     (N, E)    tokens of this batch element
    wqkv_ref:  (E, 3E)   fused QKV weight, stored as (in, out) == W^T
    bqkv_ref:  (1, 3E)
    wproj_ref: (E, E)
    bproj_ref: (1, E)
    o_ref:     (N, E)
    qkv_ref:   (N, 3E)   VMEM scratch (f32)
    attn_ref:  (N, E)    VMEM scratch (f32), merged-heads buffer
    """
    N, E = x_ref.shape
    Dh = E // num_heads
    scale = Dh ** -0.5

    # ---- Fused QKV projection: bf16 MXU operands, f32 accumulation ----
    qkv = jnp.dot(x_ref[...].astype(jnp.bfloat16),
                  wqkv_ref[...].astype(jnp.bfloat16),
                  preferred_element_type=jnp.float32)
    qkv_ref[...] = qkv + bqkv_ref[...]                     # (N, 3E) f32 scratch

    # ---- Per-head attention; results streamed into the merge scratch ----
    # qkv column layout matches torch reshape(B, N, 3, H, Dh):
    #   q -> [0, E), k -> [E, 2E), v -> [2E, 3E); head h -> [h*Dh, (h+1)*Dh).
    for h in range(num_heads):
        c = h * Dh
        q = qkv_ref[:, c:c + Dh] * scale                   # (N, Dh) f32
        k = qkv_ref[:, E + c:E + c + Dh]                   # (N, Dh) f32
        v = qkv_ref[:, 2 * E + c:2 * E + c + Dh]           # (N, Dh) f32

        # scores = q @ k^T (contract on Dh); bf16 operands -> f32 accumulate
        s = lax.dot_general(q.astype(jnp.bfloat16), k.astype(jnp.bfloat16),
                            (((1,), (1,)), ((), ())),
                            preferred_element_type=jnp.float32)      # (N, N)
        s = s - jnp.max(s, axis=-1, keepdims=True)
        p = jnp.exp(s)
        p = p / jnp.sum(p, axis=-1, keepdims=True)          # exact f32 softmax
        # TODO(synk): attn_dropout would multiply p here (identity in eval mode).

        attn_ref[:, c:c + Dh] = jnp.dot(p.astype(jnp.bfloat16),
                                        v.astype(jnp.bfloat16),
                                        preferred_element_type=jnp.float32)

    # ---- Output projection over the merged-heads slab ----
    out = jnp.dot(attn_ref[...].astype(jnp.bfloat16),
                  wproj_ref[...].astype(jnp.bfloat16),
                  preferred_element_type=jnp.float32)
    # proj_dropout is identity (eval mode).
    o_ref[...] = (out + bproj_ref[...]).astype(o_ref.dtype)


def multi_head_self_attention(x, w_qkv, b_qkv, w_proj, b_proj, *, num_heads):
    """x: (B, N, E); weights stored as (in, out) i.e. PyTorch weight.T."""
    B, N, E = x.shape
    assert E % num_heads == 0, "embed_dim must divide num_heads"
    assert w_qkv.shape == (E, 3 * E) and w_proj.shape == (E, E)
    Dh = E // num_heads
    M = B * N
    x2 = x.reshape(M, E)                      # contiguous reshape, free in XLA

    flops = (2 * M * E * (3 * E)                               # qkv projection
             + 2 * (B * num_heads) * (2 * N * N * Dh)          # scores + PV
             + 2 * M * E * E)                                  # output proj
    bytes_accessed = 4 * (2 * M * E                            # x in, out
                          + E * 3 * E + 3 * E                  # wqkv, bqkv
                          + E * E + E)                         # wproj, bproj
    cost = pl.CostEstimate(flops=flops,
                           transcendentals=B * num_heads * N * N,
                           bytes_accessed=bytes_accessed)

    out = pl.pallas_call(
        functools.partial(_mhsa_kernel, num_heads=num_heads),
        out_shape=jax.ShapeDtypeStruct((M, E), x.dtype),
        grid=(B,),
        in_specs=[
            pl.BlockSpec((N, E), lambda b: (b, 0)),          # per-batch tokens
            pl.BlockSpec((E, 3 * E), lambda b: (0, 0)),      # resident weights
            pl.BlockSpec((1, 3 * E), lambda b: (0, 0)),
            pl.BlockSpec((E, E), lambda b: (0, 0)),
            pl.BlockSpec((1, E), lambda b: (0, 0)),
        ],
        out_specs=pl.BlockSpec((N, E), lambda b: (b, 0)),
        scratch_shapes=[
            pltpu.VMEM((N, 3 * E), jnp.float32),             # qkv slab
            pltpu.VMEM((N, E), jnp.float32),                 # merged heads
        ],
        compiler_params=pltpu.CompilerParams(
            dimension_semantics=("parallel",)),              # megacore on v7x
        cost_estimate=cost,
    )(x2, w_qkv, b_qkv.reshape(1, 3 * E), w_proj, b_proj.reshape(1, E))
    return out.reshape(B, N, E)


# ----------------------------- plain-JAX reference -----------------------------

def mhsa_reference(x, w_qkv, b_qkv, w_proj, b_proj, *, num_heads):
    B, N, E = x.shape
    Dh = E // num_heads
    qkv = x @ w_qkv + b_qkv                                      # (B, N, 3E)
    qkv = qkv.reshape(B, N, 3, num_heads, Dh).transpose(2, 0, 3, 1, 4)
    q, k, v = qkv[0], qkv[1], qkv[2]                             # (B, H, N, Dh)
    s = jnp.einsum("bhqd,bhkd->bhqk", q, k) * (Dh ** -0.5)
    p = jax.nn.softmax(s, axis=-1)
    o = jnp.einsum("bhqk,bhkd->bhqd", p, v)
    o = o.transpose(0, 2, 1, 3).reshape(B, N, E)
    return o @ w_proj + b_proj


# --------------------------------- main ---------------------------------

if __name__ == "__main__":
    batch, seq, embed_dim, num_heads = 2, 16, 32, 4

    key = jax.random.PRNGKey(0)
    kx, kq, kbq, kp, kbp = jax.random.split(key, 5)
    x = jax.random.normal(kx, (batch, seq, embed_dim), dtype=jnp.float32)
    # weights stored as (in, out) == PyTorch Linear weight transposed
    w_qkv = 0.05 * jax.random.normal(kq, (embed_dim, 3 * embed_dim), jnp.float32)
    b_qkv = 0.05 * jax.random.normal(kbq, (3 * embed_dim,), jnp.float32)
    w_proj = 0.05 * jax.random.normal(kp, (embed_dim, embed_dim), jnp.float32)
    b_proj = 0.05 * jax.random.normal(kbp, (embed_dim,), jnp.float32)

    fwd = jax.jit(functools.partial(multi_head_self_attention,
                                    num_heads=num_heads))
    out = fwd(x, w_qkv, b_qkv, w_proj, b_proj)
    jax.block_until_ready(out)

    ref = mhsa_reference(x, w_qkv, b_qkv, w_proj, b_proj, num_heads=num_heads)

    assert out.shape == (batch, seq, embed_dim)
    assert bool(jnp.all(jnp.isfinite(out)))
    # tolerance accounts for bf16 MXU operands (f32 accumulation, f32 softmax)
    assert bool(jnp.allclose(out, ref, atol=2e-2, rtol=2e-2))
    print("KERNEL_OK")
</pallas_src>

<mosaic_0001>
module attributes {stable_mosaic.version = 11 : i64} {
  func.func @_mhsa_kernel(%arg0: i32, %arg1: memref<16x32xf32, #tpu.memory_space<vmem>>, %arg2: memref<32x96xf32, #tpu.memory_space<vmem>>, %arg3: memref<1x96xf32, #tpu.memory_space<vmem>>, %arg4: memref<32x32xf32, #tpu.memory_space<vmem>>, %arg5: memref<1x32xf32, #tpu.memory_space<vmem>>, %arg6: memref<16x32xf32, #tpu.memory_space<vmem>>, %arg7: memref<16x96xf32, #tpu.memory_space<vmem>>, %arg8: memref<16x32xf32, #tpu.memory_space<vmem>>) attributes {dimension_semantics = [#tpu.dimension_semantics<parallel>], iteration_bounds = array<i64: 2>, scalar_prefetch = 0 : i64, scratch_operands = 2 : i64, tpu.core_type = #tpu.core_type<tc>, window_params = [{transform_indices = @transform_0, window_bounds = array<i64: 16, 32>}, {pipeline_mode = #tpu.pipeline_mode<synchronous>, transform_indices = @transform_1, window_bounds = array<i64: 32, 96>}, {pipeline_mode = #tpu.pipeline_mode<synchronous>, transform_indices = @transform_2, window_bounds = array<i64: 1, 96>}, {pipeline_mode = #tpu.pipeline_mode<synchronous>, transform_indices = @transform_3, window_bounds = array<i64: 32, 32>}, {pipeline_mode = #tpu.pipeline_mode<synchronous>, transform_indices = @transform_4, window_bounds = array<i64: 1, 32>}, {transform_indices = @transform_5, window_bounds = array<i64: 16, 32>}]} {
    %c0 = arith.constant 0 : index
    %c0_0 = arith.constant 0 : index
    %0 = vector.load %arg1[%c0, %c0_0] : memref<16x32xf32, #tpu.memory_space<vmem>>, vector<16x32xf32>
    %1 = arith.truncf %0 : vector<16x32xf32> to vector<16x32xbf16>
    %c0_1 = arith.constant 0 : index
    %c0_2 = arith.constant 0 : index
    %2 = vector.load %arg2[%c0_1, %c0_2] : memref<32x96xf32, #tpu.memory_space<vmem>>, vector<32x96xf32>
    %3 = arith.truncf %2 : vector<32x96xf32> to vector<32x96xbf16>
    %cst = arith.constant dense<0.000000e+00> : vector<16x96xf32>
    %4 = tpu.matmul %1, %3, %cst {dimension_numbers = #tpu.dot_dimension_numbers<[1], [0], [0], [1], [0, 0, 1, 1], [], []>} : vector<16x32xbf16>, vector<32x96xbf16>, vector<16x96xf32> -> vector<16x96xf32>
    %c0_3 = arith.constant 0 : index
    %c0_4 = arith.constant 0 : index
    %5 = vector.load %arg3[%c0_3, %c0_4] : memref<1x96xf32, #tpu.memory_space<vmem>>, vector<1x96xf32>
    %6 = vector.broadcast %5 : vector<1x96xf32> to vector<16x96xf32>
    %7 = arith.addf %4, %6 : vector<16x96xf32>
    %c0_5 = arith.constant 0 : index
    %c0_6 = arith.constant 0 : index
    %8 = vector.load %arg7[%c0_5, %c0_6] : memref<16x96xf32, #tpu.memory_space<vmem>>, vector<16x96xf32>
    tpu.vector_store %arg7[%c0_5, %c0_6], %7 {strides = array<i32>} : memref<16x96xf32, #tpu.memory_space<vmem>>, vector<16x96xf32>,
    %c0_7 = arith.constant 0 : index
    %c0_8 = arith.constant 0 : index
    %9 = vector.load %arg7[%c0_7, %c0_8] : memref<16x96xf32, #tpu.memory_space<vmem>>, vector<16x8xf32>
    %cst_9 = arith.constant 0.353553385 : f32
    %10 = vector.broadcast %cst_9 : f32 to vector<16x8xf32>
    %11 = arith.mulf %9, %10 : vector<16x8xf32>
    %c0_10 = arith.constant 0 : index
    %c32 = arith.constant 32 : index
    %12 = vector.load %arg7[%c0_10, %c32] : memref<16x96xf32, #tpu.memory_space<vmem>>, vector<16x8xf32>
    %c0_11 = arith.constant 0 : index
    %c64 = arith.constant 64 : index
    %13 = vector.load %arg7[%c0_11, %c64] : memref<16x96xf32, #tpu.memory_space<vmem>>, vector<16x8xf32>
    %14 = arith.truncf %11 : vector<16x8xf32> to vector<16x8xbf16>
    %15 = arith.truncf %12 : vector<16x8xf32> to vector<16x8xbf16>
    %cst_12 = arith.constant dense<0.000000e+00> : vector<16x16xf32>
    %16 = tpu.matmul %14, %15, %cst_12 {dimension_numbers = #tpu.dot_dimension_numbers<[1], [1], [0], [0], [0, 0, 1, 0], [], []>} : vector<16x8xbf16>, vector<16x8xbf16>, vector<16x16xf32> -> vector<16x16xf32>
    %cst_13 = arith.constant dense<0xFF800000> : vector<16xf32>
    %17 = vector.multi_reduction <maximumf>, %16, %cst_13 [1] : vector<16x16xf32> to vector<16xf32>
    %18 = vector.shape_cast %17 : vector<16xf32> to vector<16x1xf32>
    %19 = vector.broadcast %18 : vector<16x1xf32> to vector<16x16xf32>
    %20 = arith.subf %16, %19 : vector<16x16xf32>
    %21 = math.exp %20 : vector<16x16xf32>
    %cst_14 = arith.constant dense<0.000000e+00> : vector<16xf32>
    %22 = vector.multi_reduction <add>, %21, %cst_14 [1] : vector<16x16xf32> to vector<16xf32>
    %23 = vector.shape_cast %22 : vector<16xf32> to vector<16x1xf32>
    %24 = vector.broadcast %23 : vector<16x1xf32> to vector<16x16xf32>
    %25 = arith.divf %21, %24 : vector<16x16xf32>
    %26 = arith.truncf %25 : vector<16x16xf32> to vector<16x16xbf16>
    %27 = arith.truncf %13 : vector<16x8xf32> to vector<16x8xbf16>
    %cst_15 = arith.constant dense<0.000000e+00> : vector<16x8xf32>
    %28 = tpu.matmul %26, %27, %cst_15 {dimension_numbers = #tpu.dot_dimension_numbers<[1], [0], [0], [1], [0, 0, 1, 1], [], []>} : vector<16x16xbf16>, vector<16x8xbf16>, vector<16x8xf32> -> vector<16x8xf32>
    %c0_16 = arith.constant 0 : index
    %c0_17 = arith.constant 0 : index
    %29 = vector.load %arg8[%c0_16, %c0_17] : memref<16x32xf32, #tpu.memory_space<vmem>>, vector<16x8xf32>
    tpu.vector_store %arg8[%c0_16, %c0_17], %28 {strides = array<i32>} : memref<16x32xf32, #tpu.memory_space<vmem>>, vector<16x8xf32>,
    %c0_18 = arith.constant 0 : index
    %c8 = arith.constant 8 : index
    %30 = vector.load %arg7[%c0_18, %c8] : memref<16x96xf32, #tpu.memory_space<vmem>>, vector<16x8xf32>
    %cst_19 = arith.constant 0.353553385 : f32
    %31 = vector.broadcast %cst_19 : f32 to vector<16x8xf32>
    %32 = arith.mulf %30, %31 : vector<16x8xf32>
    %c0_20 = arith.constant 0 : index
    %c40 = arith.constant 40 : index
    %33 = vector.load %arg7[%c0_20, %c40] : memref<16x96xf32, #tpu.memory_space<vmem>>, vector<16x8xf32>
    %c0_21 = arith.constant 0 : index
    %c72 = arith.constant 72 : index
    %34 = vector.load %arg7[%c0_21, %c72] : memref<16x96xf32, #tpu.memory_space<vmem>>, vector<16x8xf32>
    %35 = arith.truncf %32 : vector<16x8xf32> to vector<16x8xbf16>
    %36 = arith.truncf %33 : vector<16x8xf32> to vector<16x8xbf16>
    %cst_22 = arith.constant dense<0.000000e+00> : vector<16x16xf32>
    %37 = tpu.matmul %35, %36, %cst_22 {dimension_numbers = #tpu.dot_dimension_numbers<[1], [1], [0], [0], [0, 0, 1, 0], [], []>} : vector<16x8xbf16>, vector<16x8xbf16>, vector<16x16xf32> -> vector<16x16xf32>
    %cst_23 = arith.constant dense<0xFF800000> : vector<16xf32>
    %38 = vector.multi_reduction <maximumf>, %37, %cst_23 [1] : vector<16x16xf32> to vector<16xf32>
    %39 = vector.shape_cast %38 : vector<16xf32> to vector<16x1xf32>
    %40 = vector.broadcast %39 : vector<16x1xf32> to vector<16x16xf32>
    %41 = arith.subf %37, %40 : vector<16x16xf32>
    %42 = math.exp %41 : vector<16x16xf32>
    %cst_24 = arith.constant dense<0.000000e+00> : vector<16xf32>
    %43 = vector.multi_reduction <add>, %42, %cst_24 [1] : vector<16x16xf32> to vector<16xf32>
    %44 = vector.shape_cast %43 : vector<16xf32> to vector<16x1xf32>
    %45 = vector.broadcast %44 : vector<16x1xf32> to vector<16x16xf32>
    %46 = arith.divf %42, %45 : vector<16x16xf32>
    %47 = arith.truncf %46 : vector<16x16xf32> to vector<16x16xbf16>
    %48 = arith.truncf %34 : vector<16x8xf32> to vector<16x8xbf16>
    %cst_25 = arith.constant dense<0.000000e+00> : vector<16x8xf32>
    %49 = tpu.matmul %47, %48, %cst_25 {dimension_numbers = #tpu.dot_dimension_numbers<[1], [0], [0], [1], [0, 0, 1, 1], [], []>} : vector<16x16xbf16>, vector<16x8xbf16>, vector<16x8xf32> -> vector<16x8xf32>
    %c0_26 = arith.constant 0 : index
    %c8_27 = arith.constant 8 : index
    %50 = vector.load %arg8[%c0_26, %c8_27] : memref<16x32xf32, #tpu.memory_space<vmem>>, vector<16x8xf32>
    tpu.vector_store %arg8[%c0_26, %c8_27], %49 {strides = array<i32>} : memref<16x32xf32, #tpu.memory_space<vmem>>, vector<16x8xf32>,
    %c0_28 = arith.constant 0 : index
    %c16 = arith.constant 16 : index
    %51 = vector.load %arg7[%c0_28, %c16] : memref<16x96xf32, #tpu.memory_space<vmem>>, vector<16x8xf32>
    %cst_29 = arith.constant 0.353553385 : f32
    %52 = vector.broadcast %cst_29 : f32 to vector<16x8xf32>
    %53 = arith.mulf %51, %52 : vector<16x8xf32>
    %c0_30 = arith.constant 0 : index
    %c48 = arith.constant 48 : index
    %54 = vector.load %arg7[%c0_30, %c48] : memref<16x96xf32, #tpu.memory_space<vmem>>, vector<16x8xf32>
    %c0_31 = arith.constant 0 : index
    %c80 = arith.constant 80 : index
    %55 = vector.load %arg7[%c0_31, %c80] : memref<16x96xf32, #tpu.memory_space<vmem>>, vector<16x8xf32>
    %56 = arith.truncf %53 : vector<16x8xf32> to vector<16x8xbf16>
    %57 = arith.truncf %54 : vector<16x8xf32> to vector<16x8xbf16>
    %cst_32 = arith.constant dense<0.000000e+00> : vector<16x16xf32>
    %58 = tpu.matmul %56, %57, %cst_32 {dimension_numbers = #tpu.dot_dimension_numbers<[1], [1], [0], [0], [0, 0, 1, 0], [], []>} : vector<16x8xbf16>, vector<16x8xbf16>, vector<16x16xf32> -> vector<16x16xf32>
    %cst_33 = arith.constant dense<0xFF800000> : vector<16xf32>
    %59 = vector.multi_reduction <maximumf>, %58, %cst_33 [1] : vector<16x16xf32> to vector<16xf32>
    %60 = vector.shape_cast %59 : vector<16xf32> to vector<16x1xf32>
    %61 = vector.broadcast %60 : vector<16x1xf32> to vector<16x16xf32>
    %62 = arith.subf %58, %61 : vector<16x16xf32>
    %63 = math.exp %62 : vector<16x16xf32>
    %cst_34 = arith.constant dense<0.000000e+00> : vector<16xf32>
    %64 = vector.multi_reduction <add>, %63, %cst_34 [1] : vector<16x16xf32> to vector<16xf32>
    %65 = vector.shape_cast %64 : vector<16xf32> to vector<16x1xf32>
    %66 = vector.broadcast %65 : vector<16x1xf32> to vector<16x16xf32>
    %67 = arith.divf %63, %66 : vector<16x16xf32>
    %68 = arith.truncf %67 : vector<16x16xf32> to vector<16x16xbf16>
    %69 = arith.truncf %55 : vector<16x8xf32> to vector<16x8xbf16>
    %cst_35 = arith.constant dense<0.000000e+00> : vector<16x8xf32>
    %70 = tpu.matmul %68, %69, %cst_35 {dimension_numbers = #tpu.dot_dimension_numbers<[1], [0], [0], [1], [0, 0, 1, 1], [], []>} : vector<16x16xbf16>, vector<16x8xbf16>, vector<16x8xf32> -> vector<16x8xf32>
    %c0_36 = arith.constant 0 : index
    %c16_37 = arith.constant 16 : index
    %71 = vector.load %arg8[%c0_36, %c16_37] : memref<16x32xf32, #tpu.memory_space<vmem>>, vector<16x8xf32>
    tpu.vector_store %arg8[%c0_36, %c16_37], %70 {strides = array<i32>} : memref<16x32xf32, #tpu.memory_space<vmem>>, vector<16x8xf32>,
    %c0_38 = arith.constant 0 : index
    %c24 = arith.constant 24 : index
    %72 = vector.load %arg7[%c0_38, %c24] : memref<16x96xf32, #tpu.memory_space<vmem>>, vector<16x8xf32>
    %cst_39 = arith.constant 0.353553385 : f32
    %73 = vector.broadcast %cst_39 : f32 to vector<16x8xf32>
    %74 = arith.mulf %72, %73 : vector<16x8xf32>
    %c0_40 = arith.constant 0 : index
    %c56 = arith.constant 56 : index
    %75 = vector.load %arg7[%c0_40, %c56] : memref<16x96xf32, #tpu.memory_space<vmem>>, vector<16x8xf32>
    %c0_41 = arith.constant 0 : index
    %c88 = arith.constant 88 : index
    %76 = vector.load %arg7[%c0_41, %c88] : memref<16x96xf32, #tpu.memory_space<vmem>>, vector<16x8xf32>
    %77 = arith.truncf %74 : vector<16x8xf32> to vector<16x8xbf16>
    %78 = arith.truncf %75 : vector<16x8xf32> to vector<16x8xbf16>
    %cst_42 = arith.constant dense<0.000000e+00> : vector<16x16xf32>
    %79 = tpu.matmul %77, %78, %cst_42 {dimension_numbers = #tpu.dot_dimension_numbers<[1], [1], [0], [0], [0, 0, 1, 0], [], []>} : vector<16x8xbf16>, vector<16x8xbf16>, vector<16x16xf32> -> vector<16x16xf32>
    %cst_43 = arith.constant dense<0xFF800000> : vector<16xf32>
    %80 = vector.multi_reduction <maximumf>, %79, %cst_43 [1] : vector<16x16xf32> to vector<16xf32>
    %81 = vector.shape_cast %80 : vector<16xf32> to vector<16x1xf32>
    %82 = vector.broadcast %81 : vector<16x1xf32> to vector<16x16xf32>
    %83 = arith.subf %79, %82 : vector<16x16xf32>
    %84 = math.exp %83 : vector<16x16xf32>
    %cst_44 = arith.constant dense<0.000000e+00> : vector<16xf32>
    %85 = vector.multi_reduction <add>, %84, %cst_44 [1] : vector<16x16xf32> to vector<16xf32>
    %86 = vector.shape_cast %85 : vector<16xf32> to vector<16x1xf32>
    %87 = vector.broadcast %86 : vector<16x1xf32> to vector<16x16xf32>
    %88 = arith.divf %84, %87 : vector<16x16xf32>
    %89 = arith.truncf %88 : vector<16x16xf32> to vector<16x16xbf16>
    %90 = arith.truncf %76 : vector<16x8xf32> to vector<16x8xbf16>
    %cst_45 = arith.constant dense<0.000000e+00> : vector<16x8xf32>
    %91 = tpu.matmul %89, %90, %cst_45 {dimension_numbers = #tpu.dot_dimension_numbers<[1], [0], [0], [1], [0, 0, 1, 1], [], []>} : vector<16x16xbf16>, vector<16x8xbf16>, vector<16x8xf32> -> vector<16x8xf32>
    %c0_46 = arith.constant 0 : index
    %c24_47 = arith.constant 24 : index
    %92 = vector.load %arg8[%c0_46, %c24_47] : memref<16x32xf32, #tpu.memory_space<vmem>>, vector<16x8xf32>
    tpu.vector_store %arg8[%c0_46, %c24_47], %91 {strides = array<i32>} : memref<16x32xf32, #tpu.memory_space<vmem>>, vector<16x8xf32>,
    %c0_48 = arith.constant 0 : index
    %c0_49 = arith.constant 0 : index
    %93 = vector.load %arg8[%c0_48, %c0_49] : memref<16x32xf32, #tpu.memory_space<vmem>>, vector<16x32xf32>
    %94 = arith.truncf %93 : vector<16x32xf32> to vector<16x32xbf16>
    %c0_50 = arith.constant 0 : index
    %c0_51 = arith.constant 0 : index
    %95 = vector.load %arg4[%c0_50, %c0_51] : memref<32x32xf32, #tpu.memory_space<vmem>>, vector<32x32xf32>
    %96 = arith.truncf %95 : vector<32x32xf32> to vector<32x32xbf16>
    %cst_52 = arith.constant dense<0.000000e+00> : vector<16x32xf32>
    %97 = tpu.matmul %94, %96, %cst_52 {dimension_numbers = #tpu.dot_dimension_numbers<[1], [0], [0], [1], [0, 0, 1, 1], [], []>} : vector<16x32xbf16>, vector<32x32xbf16>, vector<16x32xf32> -> vector<16x32xf32>
    %c0_53 = arith.constant 0 : index
    %c0_54 = arith.constant 0 : index
    %98 = vector.load %arg5[%c0_53, %c0_54] : memref<1x32xf32, #tpu.memory_space<vmem>>, vector<1x32xf32>
    %99 = vector.broadcast %98 : vector<1x32xf32> to vector<16x32xf32>
    %100 = arith.addf %97, %99 : vector<16x32xf32>
    %c0_55 = arith.constant 0 : index
    %c0_56 = arith.constant 0 : index
    %101 = vector.load %arg6[%c0_55, %c0_56] : memref<16x32xf32, #tpu.memory_space<vmem>>, vector<16x32xf32>
    tpu.vector_store %arg6[%c0_55, %c0_56], %100 {strides = array<i32>} : memref<16x32xf32, #tpu.memory_space<vmem>>, vector<16x32xf32>,
    return
  }
  func.func @transform_0(%arg0: i32) -> (i32, i32) {
    %c0_i32 = arith.constant 0 : i32
    %c0_i32_0 = arith.constant 0 : i32
    return %arg0, %c0_i32 : i32, i32
  }
  func.func @transform_1(%arg0: i32) -> (i32, i32) {
    %c0_i32 = arith.constant 0 : i32
    %c0_i32_0 = arith.constant 0 : i32
    %c0_i32_1 = arith.constant 0 : i32
    return %c0_i32, %c0_i32_0 : i32, i32
  }
  func.func @transform_2(%arg0: i32) -> (i32, i32) {
    %c0_i32 = arith.constant 0 : i32
    %c0_i32_0 = arith.constant 0 : i32
    %c0_i32_1 = arith.constant 0 : i32
    return %c0_i32, %c0_i32_0 : i32, i32
  }
  func.func @transform_3(%arg0: i32) -> (i32, i32) {
    %c0_i32 = arith.constant 0 : i32
    %c0_i32_0 = arith.constant 0 : i32
    %c0_i32_1 = arith.constant 0 : i32
    return %c0_i32, %c0_i32_0 : i32, i32
  }
  func.func @transform_4(%arg0: i32) -> (i32, i32) {
    %c0_i32 = arith.constant 0 : i32
    %c0_i32_0 = arith.constant 0 : i32
    %c0_i32_1 = arith.constant 0 : i32
    return %c0_i32, %c0_i32_0 : i32, i32
  }
  func.func @transform_5(%arg0: i32) -> (i32, i32) {
    %c0_i32 = arith.constant 0 : i32
    %c0_i32_0 = arith.constant 0 : i32
    return %arg0, %c0_i32 : i32, i32
  }
}

</mosaic_0001>

<bundles_post_ra>
// kernel: multi_head_self_attention.1
= control target key start
LH: loop header
LB: loop body
LE: loop exit
PB: predicated region body
PF: predicated region fallthrough
CT: control target
= control target key end

     0   :  { %10 = vsyncpa [#allocation5], 0  ;;  %s1790_s0 = inlined_call_operand.hbm [shape: f32[32,32], index: 0, kind: input, shape index: {}]   ;;  %s1791_s1 = inlined_call_operand.hbm [shape: f32[32,96], index: 1, kind: input, shape index: {}]   ;;  %s1792_s2 = inlined_call_operand.vmem [shape: f32[1,96], index: 2, kind: input, shape index: {}]   ;;  %s1793_s3 = inlined_call_operand.hbm [shape: f32[32,32], index: 3, kind: input, shape index: {}]   ;;  %s1794_s4 = inlined_call_operand.vmem [shape: f32[1,32], index: 4, kind: input, shape index: {}]   ;;  %s1795_s5 = inlined_call_operand.hbm [shape: f32[32,32], index: 5, kind: output, shape index: {}]  }
   0x1   :  { %12 = vsyncpa [#allocation5 + $0x1], 0 }
   0x2   :  { %13 = vsyncpa [#allocation8], 0 }
   0x3   :  { %14 = vsyncpa [#allocation6], 0 }
   0x4   :  { %16 = vsyncpa [#allocation6 + $0x1], 0  ;;  %s1496_s18 = smov 0   ;;  %s1498_s19 = smov 0  }
   0x5   :  { %s1500_s20 = smov 0   ;;  %s1502_s21 = smov 0  }
   0x6 LB: > { %s1517_s22 = sadd.s32 4294967295, %s1441_s21   ;;  %s1057_s23 = sadd.s32 4294967294, %s1441_s21   ;;  %s1441_s21 = sphi %s1502_s21, %s1818_s21   ;;  %s1437_s20 = sphi %s1500_s20, %s1817_s20   ;;  %s1433_s19 = sphi %s1498_s19, %s1816_s19   ;;  %s1429_s18 = sphi %s1496_s18, %s1815_s18  }
   0x7   : > { %p42_p0 = scmp.ne.s32.totalorder %s1433_s19, %s1429_s18  ;;  %p1796_p1 = scmp.eq.s32.totalorder %s1517_s22, 0 }
   0x8   : > { %p150_p2 = scmp.eq.s32.totalorder %s1517_s22, 1  ;;  %p156_p3 = scmp.eq.s32.totalorder %s1057_s23, 1 }
   0x9   : > { %p1526_p4 = por %p1796_p1, %p42_p0  ;;  %p1058_p5 = scmp.ge.s32.totalorder %s1441_s21, 1 }
   0xa   : > { %p1531_p6 = por %p156_p3, %p42_p0  ;;  %p163_p7 = scmp.lt.s32.totalorder %s1441_s21, 3 }
   0xb   : > { %s1801_s24 = scalar_select %p1526_p4, 1, 0 }
   0xc   : > { %s1802_s25 = scalar_select %p1531_p6, 1, 0 }
   0xd   : > { %p1536_p8 = pnand %p1058_p5, %p163_p7  ;;  %s1443_s27 = smov [#allocation7]  }
   0xe   : > { %s175_s28 = sshll.u32 %s1443_s27, 4  ;;  %s1444_s30 = smov [#allocation9]   ;;  %s176_s28 = int_to_ptr.vmem [resolvable:$true] %s175_s28 }
   0xf   : > { %s1803_s26 = scalar_select %p1536_p8, 1, 0 }
  0x10   : > { %p1187_p9 = pneg %p1536_p8  ;;  %s191_s6 = sshll.u32 %s1444_s30, 4  ;;  %s192_s6 = int_to_ptr.vmem [resolvable:$true] %s191_s6 }
  0x11   : > { %s1304_s7 = scalar_lea.vmem %s176_s28, 512  ;;  %p1312_p5 = scmp.lt.s32.totalorder %s176_s28, %s176_s28 }
  0x12   : > { %p1545_p11 = pnand %p1187_p9, %p1796_p1  ;;  %p1305_p13 = scmp.ne.s32.totalorder %s176_s28, %s1304_s7 }
  0x13   : > { %p1313_p7 = scmp.lt.s32.totalorder %s1304_s7, %s1304_s7 }
  0x14   : > { %p1295_p12 = pneg %p1545_p11 }
  0x15   : > { %p1314_p10 = por %p1313_p7, %p1312_p5 }
  0x16   : > { %p1307_p0 = pnand %p1305_p13, %p1295_p12 }
  0x18   : > { %p1308_p3 = pneg %p1307_p0 }
  0x1a   : > { %p1315_p9 = pnand %p1314_p10, %p1308_p3 }
  0x1c   : > { %1318 = shalt.err (!%p1315_p9)
}
  0x1d   : > { %s1797_s8 = smov 128   ;;  %s1446_s9 = smov 8  }
  0x1e   : > { %1190 = dma.hbm_to_vmem [thread:$0]  (!%p1545_p11), %s1791_s1, 512, %s176_s28, [#allocation8], %s1797_s8, %s1797_s8, %s1446_s9  }
  0x1f   : > { %s1330_s12 = scalar_lea.vmem %s192_s6, 512  ;;  %p1338_p10 = scmp.lt.s32.totalorder %s192_s6, %s192_s6 }
  0x20   : > { %p1331_p13 = scmp.ne.s32.totalorder %s192_s6, %s1330_s12  ;;  %p1339_p3 = scmp.lt.s32.totalorder %s1330_s12, %s1330_s12 }
  0x22   : > { %p1333_p0 = pnand %p1331_p13, %p1295_p12  ;;  %p1340_p7 = por %p1339_p3, %p1338_p10 }
  0x24   : > { %p1334_p5 = pneg %p1333_p0 }
  0x26   : > { %p1341_p9 = pnand %p1340_p7, %p1334_p5 }
  0x28   : > { %1344 = shalt.err (!%p1341_p9)
}
  0x29   : > { %1193 = dma.hbm_to_vmem [thread:$0]  (!%p1545_p11), %s1793_s3, 512, %s192_s6, [#allocation8], %s1797_s8, %s1797_s8, %s1446_s9  }
  0x2a   : > { %s1574_s15 = sadd.s32 1, %s1441_s21   ;;  %s29_s16 = sadd.s32 1, %s1437_s20 }
  0x2b   : > { %s26_s17 = ssub.s32 %s1441_s21, %s1574_s15  ;;  %p36_p12 = scmp.ne.s32.totalorder %s1437_s20, %s1433_s19 }
  0x2c   : > { %p27_p13 = scmp.eq.s32.totalorder %s26_s17, 0  ;;  %p37_p0 = scmp.eq.s32.totalorder %s1441_s21, 0 }
  0x2d   : > { %p1584_p5 = por %p150_p2, %p36_p12  ;;  %p1204_p10 = scmp.lt.s32.totalorder %s1441_s21, 2 }
  0x2e   : > { %s1590_s27 = scalar_select %p27_p13, %s1437_s20, %s29_s16  }
  0x2f   : > { %s1805_s23 = scalar_select %p1584_p5, 1, 0 }
  0x30   : > { %p38_p3 = por %p37_p0, %p36_p12  ;;  %s208_s28 = sand.u32 1, %s1437_s20  }
  0x31   : > { %s1062_s29 = sshll.u32 %s208_s28, 4  ;;  %s1087_s30 = sshll.u32 %s1441_s21, 8 }
  0x32   : > { %s1597_s10 = scalar_lea.hbm %s1790_s0, %s1087_s30  ;;  %s212_s11 = scalar_lea.vmem [#allocation4], %s1062_s29 }
  0x33   : > { %s219_s12 = sshll.u32 %s212_s11, 4  ;;  %p1601_p2 = pnand %p1204_p10, %p38_p3  ;;  %s1599_s12 = int_to_ptr.vmem [resolvable:$true] %s219_s12 }
  0x34   : > { %s1605_s14 = scalar_lea.sflag [#allocation5], %s208_s28  ;;  %s1345_s16 = scalar_lea.hbm %s1597_s10, 256 }
  0x35   : > { %p1346_p11 = scmp.ne.s32.totalorder %s1597_s10, %s1345_s16  ;;  %p1347_p7 = pneg %p1601_p2 }
  0x36   : > { %s1350_s29 = scalar_lea.hbm %s1790_s0, 512  ;;  %p1351_p13 = scmp.lt.s32.totalorder %s1597_s10, %s1790_s0 }
  0x37   : > { %p1348_p9 = pnand %p1347_p7, %p1346_p11  ;;  %p1352_p0 = scmp.lt.s32.totalorder %s1350_s29, %s1345_s16 }
  0x39   : > { %p1349_p12 = pneg %p1348_p9  ;;  %p1353_p10 = por %p1352_p0, %p1351_p13 }
  0x3b   : > { %p1354_p3 = pnand %p1353_p10, %p1349_p12 }
  0x3d   : > { %1357 = shalt.err (!%p1354_p3)
}
  0x3e   : > { %s1358_s28 = scalar_lea.vmem %s1599_s12, 256  ;;  %s1447_s11 = smov [#allocation4]  }
  0x3f   : > { %p1359_p1 = scmp.ne.s32.totalorder %s1599_s12, %s1358_s28  ;;  %s1363_s8 = sshll.u32 %s1447_s11, 4  ;;  %s1364_s8 = int_to_ptr.vmem [resolvable:$false] %s1363_s8 }
  0x40   : > { %s1365_s17 = scalar_lea.vmem %s1364_s8, 512  ;;  %p1366_p9 = scmp.lt.s32.totalorder %s1599_s12, %s1364_s8 }
  0x41   : > { %p1361_p6 = pnand %p1359_p1, %p1347_p7  ;;  %p1367_p5 = scmp.lt.s32.totalorder %s1365_s17, %s1358_s28 }
  0x43   : > { %p1362_p11 = pneg %p1361_p6  ;;  %p1368_p4 = por %p1367_p5, %p1366_p9 }
  0x45   : > { %p1369_p8 = pnand %p1368_p4, %p1362_p11 }
  0x47   : > { %1372 = shalt.err (!%p1369_p8)
}
  0x48   : > { %s1807_s16 = smov 128   ;;  %p1808_p1 = scmp.ne.s32.totalorder %s1803_s26, 0 }
  0x49   : > { %1197 = dma.hbm_to_vmem [thread:$0]  (!%p1601_p2), %s1597_s10, 256, %s1599_s12, %s1605_s14, %s1807_s16, %s1807_s16, %s1446_s9  }
  0x4a   : > { %231 = sbr.rel (%p1808_p1) target bundleno = 1540 (0x604), region = 40  ;;  %s1632_s30 = sand.u32 (!%p1808_p1), 1, %s1433_s19  }
  0x4b   : > { %s1066_s8 = sshll.u32 (!%p1808_p1), %s1632_s30, 4  ;;  %s234_s29 = scalar_lea.sflag (!%p1808_p1), [#allocation5], %s1632_s30 }
  0x4c   : > { %s237_s13 = scalar_lea.vmem (!%p1808_p1), [#allocation4], %s1066_s8  ;;  %p1809_p4 = scmp.ne.s32.totalorder (!%p1808_p1), %s1801_s24, 0 }
  0x4f   : > { %1416 = dma.done.wait (%p1809_p4), %s234_s29, 256  }
  0x50   : > { %1418 = vsyncadd (%p1809_p4), %s234_s29, 4294967040  ;;  %p1810_p6 = scmp.eq.s32.totalorder %s1517_s22, 0 }
  0x52   : > { %1420 = dma.done.wait (%p1810_p6), [#allocation8], 1024   ;;  %p1811_p8 = pmov %p1810_p6 }
  0x53   : > { %v1448_v0 = vmov 0.0   ;;  %vm1449_vm0 = vmmov 0   ;;  %v280_v1 = vld [vmem:[#allocation7 + $0x10] sm:$0xff]  ;;  %v281_v2 = vld [vmem:[#allocation7 + $0x18] sm:$0xff]  ;;  %v278_v3 = vld [vmem:[#allocation7] sm:$0xff]  ;;  %vm291_vm1 = vcmask 261120  }
  0x54   : > { %1422 = vsyncadd (%p1811_p8), [#allocation8], 4294966272  ;;  %1111 = vmatprep.subr.bf16.mxu0 %v1448_v0  ;;  %1115 = vmatprep.mubr.msk.bf16.mxu0 %vm1449_vm0, %v1448_v0  ;;  %v283_v4 = vpack.c.bf16 %v281_v2, %v280_v1  ;;  %v279_v5 = vld [vmem:[#allocation7 + $0x8] sm:$0xff]  ;;  %v275_v7 = vld [vmem:[%s237_s13] sm:$0xff]  ;;  %vm336_vm2 = vcmask 785408   ;;  %s1450_s9 = smov 96  }
  0x55   : > { %1119 = vmatprep.subr.bf16.mxu1 %v1448_v0  ;;  %1121 = vmatprep.mubr.msk.bf16.mxu1 %vm1449_vm0, %v1448_v0  ;;  %v282_v6 = vpack.c.bf16 %v279_v5, %v278_v3  ;;  %v276_v8 = vld [vmem:[%s237_s13 + $0x8] sm:$0xff]  ;;  %v1070_v10 = vld [vmem:[%s1792_s2] ss:$0 sm:$0xff]  ;;  %s1451_s10 = smov 120   ;;  %s1452_s12 = smov 88   ;;  %vm348_vm3 = vcmask 64512  }
  0x56   : > { %1112 = vmatpush3.bf16.msra.mxu0 %v283_v4  ;;  %v277_v9 = vpack.c.bf16 %v276_v8, %v275_v7  ;;  %s1453_s14 = smov 80   ;;  %s1454_s6 = smov 112   ;;  %vm396_vm4 = vcmask 130048   ;;  %vm606_vm5 = vcmask 130112   ;;  %vm746_vm6 = vcmask 195712  }
  0x57   : > { %1113 = vmatprep.subr.bf16.mxu0 %v1448_v0  ;;  %s1455_s7 = smov 72   ;;  %s1456_s28 = smov 104   ;;  %vm886_vm7 = vcmask 261312  }
  0x58   : > { %s1457_s11 = smov 56   ;;  %s1458_s17 = smov 64  }
  0x59   : > { %s1459_s16 = smov 48   ;;  %s1460_s29 = smov 40  }
  0x5a   : > { %1114 = vmatpush3.bf16.msra.mxu0 %v282_v6  ;;  %s1461_s13 = smov 8   ;;  %s1462_s24 = smov 16  }
  0x5b   : > { %1125 = vmatprep.subr.bf16.mxu0 %v1448_v0  ;;  %s1463_s26 = smov 24   ;;  %p1812_p2 = scmp.ne.s32.totalorder %s1805_s23, 0 }
  0x5d   : > { %1116 = vmatmul.mubr.msk.bf16.vlgmr.msra.gmra.mxu0 %vm291_vm1, %v277_v9 }
  0x5e   : > { %1127 = vmatprep.mubr.msk.bf16.mxu0 %vm1449_vm0, %v1448_v0 }
 0x11d   : > { %v329_v11 = vpop.f32.mrf.mxu0 }
 0x11e   : > { %v330_v12 = vadd.f32 %v1070_v10, %v329_v11 }
 0x11f   : > { %v1117_v13 = vpop.f32.mrf.mxu0 }
 0x120   : > { %337 = vst.msk [vmem:[#allocation2] sm:$0xff] %vm336_vm2, %v330_v12 }
 0x121   : > { %v332_v14 = vpop.f32.mrf.mxu0 }
 0x122   : > { %v333_v15 = vadd.f32 %v1070_v10, %v332_v14 }
 0x123   : > { %v1118_v16 = vpop.f32.mrf.mxu0 }
 0x124   : > { %338 = vst.msk [vmem:[#allocation2 + $0x8] sm:$0xff] %vm336_vm2, %v333_v15 }
 0x127   : > { %v339_v17 = vld [vmem:[#allocation2] sm:$0xff] }
 0x128   : > { %v341_v19 = vmul.f32 0.35355338, %v339_v17 }
 0x12b   : > { %v340_v18 = vld [vmem:[#allocation2 + $0x8] sm:$0xff] }
 0x12c   : > { %v1660_v20 = vpack.c.bf16 %v340_v18, %v339_v17  ;;  %v342_v21 = vmul.f32 0.35355338, %v340_v18 }
 0x12e   : > { %346 = vrot.lane.b32.xlu0 %v1660_v20, %s1450_s9  ;;  %v343_v22 = vpack.c.bf16 %v342_v21, %v341_v19 }
 0x130   : > { %476 = vrot.lane.b32.xlu1 %v343_v22, %s1451_s10 }
 0x132   : > { %479 = vrot.lane.b32.xlu0 %v1660_v20, %s1452_s12  ;;  %s271_s12 = scalar_lea.vmem [#allocation10], %s1066_s8  ;;  %s952_s8 = scalar_lea.sflag [#allocation6], %s1632_s30 }
 0x134   : > { %619 = vrot.lane.b32.xlu1 %v1660_v20, %s1453_s14  ;;  %s965_s14 = sshll.u32 %s271_s12, 4  ;;  %s1740_s14 = int_to_ptr.vmem [resolvable:$true] %s965_s14 }
 0x136   : > { %616 = vrot.lane.b32.xlu0 %v343_v22, %s1454_s6  ;;  %s1088_s6 = sshll.u32 %s1517_s22, 8  ;;  %s1464_s22 = smov [#allocation10]  }
 0x138   : > { %759 = vrot.lane.b32.xlu1 %v1660_v20, %s1455_s7 }
 0x13a   : > { %756 = vrot.lane.b32.xlu0 %v343_v22, %s1456_s28 }
 0x1a0   : > { %v347_v23 = vpop.permute.xlu0 %346 }
 0x1a1   : > { %v353_v24 = vsel %vm348_vm3, %v347_v23, 0 }
 0x1a2   : > { %1120 = vmatpush3.bf16.xpose.msra.mxu1 %v353_v24  ;;  %v477_v26 = vpop.permute.xlu1 %476 }
 0x1a3   : > { %1131 = vmatprep.subr.bf16.mxu1 %v1448_v0 }
 0x1a4   : > { %v480_v25 = vpop.permute.xlu0 %479 }
 0x1a5   : > { %v485_v27 = vsel %vm348_vm3, %v480_v25, 0 }
 0x1a6   : > { %v620_v28 = vpop.permute.xlu1 %619 }
 0x1a7   : > { %v625_v29 = vsel %vm348_vm3, %v620_v28, 0 }
 0x1a8   : > { %v617_v31 = vpop.permute.xlu0 %616 }
 0x1a9   : > { %1122 = vmatmul.mubr.msk.bf16.vlgmr.msra.gmra.mxu1 %vm348_vm3, %v343_v22 }
 0x1aa   : > { %1132 = vmatpush3.bf16.xpose.msra.mxu1 %v485_v27  ;;  %1133 = vmatprep.mubr.msk.bf16.mxu1 %vm1449_vm0, %v1448_v0  ;;  %v760_v30 = vpop.permute.xlu1 %759 }
 0x1ab   : > { %1143 = vmatprep.subr.bf16.mxu1 %v1448_v0  ;;  %v765_v32 = vsel %vm348_vm3, %v760_v30, 0 }
 0x1ac   : > { %v757_v33 = vpop.permute.xlu0 %756 }
 0x1b1   : > { %1134 = vmatmul.mubr.msk.bf16.vlgmr.msra.gmra.mxu1 %vm348_vm3, %v477_v26 }
 0x1b2   : > { %1144 = vmatpush3.bf16.xpose.msra.mxu1 %v625_v29  ;;  %1145 = vmatprep.mubr.msk.bf16.mxu1 %vm1449_vm0, %v1448_v0 }
 0x1b3   : > { %1155 = vmatprep.subr.bf16.mxu1 %v1448_v0 }
 0x1b9   : > { %1146 = vmatmul.mubr.msk.bf16.vlgmr.msra.gmra.mxu1 %vm348_vm3, %v617_v31 }
 0x1ba   : > { %1156 = vmatpush3.bf16.xpose.msra.mxu1 %v765_v32  ;;  %1157 = vmatprep.mubr.msk.bf16.mxu1 %vm1449_vm0, %v1448_v0 }
 0x1bb   : > { %1167 = vmatprep.subr.bf16.mxu1 %v1448_v0 }
 0x1c1   : > { %1158 = vmatmul.mubr.msk.bf16.vlgmr.msra.gmra.mxu1 %vm348_vm3, %v757_v33 }
 0x1c2   : > { %1171 = vmatprep.mubr.msk.bf16.mxu1 %vm1449_vm0, %v1448_v0 }
 0x269   : > { %v389_v34 = vpop.f32.mrf.mxu1 }
 0x26a   : > { %v397_v35 = vsel %vm396_vm4, %v389_v34, -inf }
 0x26b   : > { %398 = vmax.xlane.f32.xlu1 %v397_v35  ;;  %v1123_v36 = vpop.f32.mrf.mxu1 }
 0x26d   : > { %v392_v37 = vpop.f32.mrf.mxu1 }
 0x26e   : > { %v400_v38 = vsel %vm396_vm4, %v392_v37, -inf }
 0x26f   : > { %401 = vmax.xlane.f32.xlu0 %v400_v38  ;;  %v1124_v39 = vpop.f32.mrf.mxu1 }
 0x271   : > { %v521_v40 = vpop.f32.mrf.mxu1 }
 0x272   : > { %v528_v41 = vsel %vm396_vm4, %v521_v40, -inf }
 0x273   : > { %529 = vmax.xlane.f32.xlu0 %v528_v41  ;;  %v1135_v42 = vpop.f32.mrf.mxu1 }
 0x275   : > { %v524_v43 = vpop.f32.mrf.mxu1 }
 0x276   : > { %v531_v44 = vsel %vm396_vm4, %v524_v43, -inf }
 0x277   : > { %532 = vmax.xlane.f32.xlu1 %v531_v44  ;;  %v1136_v45 = vpop.f32.mrf.mxu1 }
 0x279   : > { %v661_v46 = vpop.f32.mrf.mxu1 }
 0x27a   : > { %v668_v47 = vsel %vm396_vm4, %v661_v46, -inf }
 0x27b   : > { %669 = vmax.xlane.f32.xlu0 %v668_v47  ;;  %v1147_v48 = vpop.f32.mrf.mxu1 }
 0x27d   : > { %v664_v49 = vpop.f32.mrf.mxu1 }
 0x27e   : > { %v671_v50 = vsel %vm396_vm4, %v664_v49, -inf }
 0x27f   : > { %672 = vmax.xlane.f32.xlu1 %v671_v50  ;;  %v1148_v51 = vpop.f32.mrf.mxu1 }
 0x281   : > { %v801_v52 = vpop.f32.mrf.mxu1 }
 0x282   : > { %v808_v53 = vsel %vm396_vm4, %v801_v52, -inf }
 0x283   : > { %809 = vmax.xlane.f32.xlu0 %v808_v53  ;;  %v1159_v54 = vpop.f32.mrf.mxu1 }
 0x285   : > { %v804_v55 = vpop.f32.mrf.mxu1 }
 0x286   : > { %v811_v56 = vsel %vm396_vm4, %v804_v55, -inf }
 0x287   : > { %812 = vmax.xlane.f32.xlu1 %v811_v56  ;;  %v1160_v57 = vpop.f32.mrf.mxu1 }
 0x2f4   : > { %v399_v58 = vpop.xlane.xlu1 %398 }
 0x2f5   : > { %v403_v59 = vsub.f32 %v389_v34, %v399_v58 }
 0x2f7   : > { %v405_v60 = vmul.f32 1.442695, %v403_v59 }
 0x2f8   : > { %v402_v61 = vpop.xlane.xlu0 %401 }
 0x2f9   : > { %1261 = vpow2.f32 %v405_v60  ;;  %v404_v62 = vsub.f32 %v392_v37, %v402_v61 }
 0x2fb   : > { %v407_v63 = vmul.f32 1.442695, %v404_v62 }
 0x2fc   : > { %v530_v1 = vpop.xlane.xlu0 %529 }
 0x2fd   : > { %1263 = vpow2.f32 %v407_v63  ;;  %v534_v2 = vsub.f32 %v521_v40, %v530_v1 }
 0x2ff   : > { %v536_v3 = vmul.f32 1.442695, %v534_v2 }
 0x300   : > { %v533_v10 = vpop.xlane.xlu1 %532 }
 0x301   : > { %1265 = vpow2.f32 %v536_v3  ;;  %v535_v11 = vsub.f32 %v524_v43, %v533_v10 }
 0x303   : > { %v538_v15 = vmul.f32 1.442695, %v535_v11 }
 0x304   : > { %v670_v12 = vpop.xlane.xlu0 %669 }
 0x305   : > { %v674_v14 = vsub.f32 %v661_v46, %v670_v12  ;;  %1267 = vpow2.f32 %v538_v15  ;;  %v892_v15 = vld [vmem:[#allocation9] sm:$0xff] }
 0x306   : > { %v1262_v4 = vpop.eup %1261 }
 0x307   : > { %v409_v5 = vsel %vm396_vm4, %v1262_v4, 0.0  ;;  %v676_v19 = vmul.f32 1.442695, %v674_v14  ;;  %v895_v14 = vld [vmem:[#allocation9 + $0x18] sm:$0xff] }
 0x308   : > { %410 = vadd.xlane.f32.xlu0 %v409_v5  ;;  %v673_v13 = vpop.xlane.xlu1 %672 }
 0x309   : > { %v675_v16 = vsub.f32 %v664_v49, %v673_v13  ;;  %1269 = vpow2.f32 %v676_v19  ;;  %v894_v13 = vld [vmem:[#allocation9 + $0x10] sm:$0xff] }
 0x30a   : > { %v1264_v6 = vpop.eup %1263 }
 0x30b   : > { %v412_v7 = vsel %vm396_vm4, %v1264_v6, 0.0  ;;  %v678_v22 = vmul.f32 1.442695, %v675_v16  ;;  %v897_v16 = vpack.c.bf16 %v895_v14, %v894_v13 }
 0x30c   : > { %413 = vadd.xlane.f32.xlu1 %v412_v7  ;;  %v810_v17 = vpop.xlane.xlu0 %809 }
 0x30d   : > { %v814_v21 = vsub.f32 %v801_v52, %v810_v17  ;;  %1271 = vpow2.f32 %v678_v22  ;;  %v893_v17 = vld [vmem:[#allocation9 + $0x8] sm:$0xff]  ;;  %1168 = vmatpush3.bf16.msra.mxu1 %v897_v16 }
 0x30e   : > { %v1696_v8 = vpop.eup %1265  ;;  %v896_v19 = vpack.c.bf16 %v893_v17, %v892_v15  ;;  %1169 = vmatprep.subr.bf16.mxu1 %v1448_v0 }
 0x30f   : > { %v540_v9 = vsel %vm396_vm4, %v1696_v8, 0.0  ;;  %v816_v24 = vmul.f32 1.442695, %v814_v21 }
 0x310   : > { %541 = vadd.xlane.f32.xlu0 %v540_v9  ;;  %v813_v18 = vpop.xlane.xlu1 %812 }
 0x311   : > { %v815_v23 = vsub.f32 %v804_v55, %v813_v18  ;;  %1273 = vpow2.f32 %v816_v24  ;;  %1170 = vmatpush3.bf16.msra.mxu1 %v896_v19 }
 0x312   : > { %v1268_v26 = vpop.eup %1267 }
 0x313   : > { %v818_v25 = vmul.f32 1.442695, %v815_v23  ;;  %v543_v28 = vsel %vm396_vm4, %v1268_v26, 0.0 }
 0x315   : > { %1275 = vpow2.f32 %v818_v25 }
 0x316   : > { %v1270_v27 = vpop.eup %1269 }
 0x317   : > { %v680_v31 = vsel %vm396_vm4, %v1270_v27, 0.0 }
 0x31a   : > { %v1272_v29 = vpop.eup %1271 }
 0x31b   : > { %v683_v32 = vsel %vm396_vm4, %v1272_v29, 0.0 }
 0x31d   : > { %551 = vrot.lane.b32.xlu1 %v1660_v20, %s1457_s11  ;;  %s1745_s11 = scalar_lea.hbm %s1795_s5, %s1088_s6 }
 0x31e   : > { %v1703_v30 = vpop.eup %1273 }
 0x31f   : > { %v820_v34 = vsel %vm396_vm4, %v1703_v30, 0.0 }
 0x322   : > { %v1276_v33 = vpop.eup %1275 }
 0x323   : > { %v823_v35 = vsel %vm396_vm4, %v1276_v33, 0.0 }
 0x326   : > { %420 = vrot.lane.b32.xlu0 %v1660_v20, %s1458_s17  ;;  %s1373_s17 = scalar_lea.vmem %s1740_s14, 256 }
 0x327   : > { %p1374_p5 = scmp.ne.s32.totalorder %s1740_s14, %s1373_s17 }
 0x329   : > { %p1375_p7 = pnand %p1374_p5, %p1812_p2 }
 0x32b   : > { %p1376_p12 = pneg %p1375_p7 }
 0x341   : > { %544 = vadd.xlane.f32.xlu1 %v543_v28 }
 0x345   : > { %681 = vadd.xlane.f32.xlu0 %v680_v31  ;;  %684 = vadd.xlane.f32.xlu1 %v683_v32 }
 0x349   : > { %821 = vadd.xlane.f32.xlu0 %v820_v34  ;;  %824 = vadd.xlane.f32.xlu1 %v823_v35  ;;  %v1080_v35 = vld [vmem:[%s1794_s4] ss:$0 sm:$0xff] }
 0x35a   : > { %691 = vrot.lane.b32.xlu1 %v1660_v20, %s1459_s16  ;;  %s1377_s16 = sshll.u32 %s1464_s22, 4  ;;  %s1378_s16 = int_to_ptr.vmem [resolvable:$false] %s1377_s16 }
 0x35b   : > { %p1380_p13 = scmp.lt.s32.totalorder %s1740_s14, %s1378_s16 }
 0x35f   : > { %831 = vrot.lane.b32.xlu0 %v1660_v20, %s1460_s29  ;;  %s1379_s29 = scalar_lea.vmem %s1378_s16, 512 }
 0x360   : > { %p1381_p0 = scmp.lt.s32.totalorder %s1379_s29, %s1373_s17 }
 0x362   : > { %p1382_p10 = por %p1381_p0, %p1380_p13 }
 0x364   : > { %p1383_p3 = pnand %p1382_p10, %p1376_p12 }
 0x391   : > { %v411_v36 = vpop.xlane.xlu0 %410 }
 0x392   : > { %1277 = vrcp.f32 %v411_v36 }
 0x395   : > { %v414_v37 = vpop.xlane.xlu1 %413 }
 0x396   : > { %1279 = vrcp.f32 %v414_v37 }
 0x399   : > { %v542_v38 = vpop.xlane.xlu0 %541  ;;  %v552_v45 = vpop.permute.xlu1 %551 }
 0x39a   : > { %1281 = vrcp.f32 %v542_v38 }
 0x39d   : > { %v421_v39 = vpop.permute.xlu0 %420 }
 0x39e   : > { %1126 = vmatpush3.bf16.msra.mxu0 %v421_v39 }
 0x39f   : > { %1137 = vmatprep.subr.bf16.mxu0 %v1448_v0  ;;  %v1278_v40 = vpop.eup %1277 }
 0x3a0   : > { %v416_v42 = vmul.f32 %v1278_v40, %v1262_v4 }
 0x3a3   : > { %v1280_v41 = vpop.eup %1279 }
 0x3a4   : > { %v418_v43 = vmul.f32 %v1280_v41, %v1264_v6 }
 0x3a6   : > { %v419_v44 = vpack.c.bf16 %v418_v43, %v416_v42 }
 0x3a7   : > { %v1282_v50 = vpop.eup %1281 }
 0x3a8   : > { %1128 = vmatmul.mubr.msk.bf16.vlgmr.msra.gmra.mxu0 %vm396_vm4, %v419_v44  ;;  %v547_v52 = vmul.f32 %v1282_v50, %v1696_v8 }
 0x3a9   : > { %1138 = vmatpush3.bf16.msra.mxu0 %v552_v45  ;;  %1139 = vmatprep.mubr.msk.bf16.mxu0 %vm1449_vm0, %v1448_v0 }
 0x3aa   : > { %1149 = vmatprep.subr.bf16.mxu0 %v1448_v0 }
 0x3ca   : > { %v545_v20 = vpop.xlane.xlu1 %544 }
 0x3cb   : > { %1283 = vrcp.f32 %v545_v20 }
 0x3ce   : > { %v682_v46 = vpop.xlane.xlu0 %681  ;;  %v685_v47 = vpop.xlane.xlu1 %684 }
 0x3cf   : > { %1285 = vrcp.f32 %v682_v46 }
 0x3d0   : > { %1287 = vrcp.f32 %v685_v47 }
 0x3d2   : > { %v822_v48 = vpop.xlane.xlu0 %821  ;;  %v825_v49 = vpop.xlane.xlu1 %824 }
 0x3d3   : > { %1289 = vrcp.f32 %v822_v48 }
 0x3d4   : > { %1291 = vrcp.f32 %v825_v49 }
 0x3d6   : > { %v692_v57 = vpop.permute.xlu1 %691  ;;  %v832_v63 = vpop.permute.xlu0 %831 }
 0x3d8   : > { %v1284_v51 = vpop.eup %1283 }
 0x3d9   : > { %v549_v53 = vmul.f32 %v1284_v51, %v1268_v26 }
 0x3db   : > { %v550_v54 = vpack.c.bf16 %v549_v53, %v547_v52 }
 0x3dc   : > { %v1286_v55 = vpop.eup %1285 }
 0x3dd   : > { %v1288_v56 = vpop.eup %1287  ;;  %1140 = vmatmul.mubr.msk.bf16.vlgmr.msra.gmra.mxu0 %vm396_vm4, %v550_v54  ;;  %v687_v58 = vmul.f32 %v1286_v55, %v1270_v27 }
 0x3de   : > { %1150 = vmatpush3.bf16.msra.mxu0 %v692_v57  ;;  %1151 = vmatprep.mubr.msk.bf16.mxu0 %vm1449_vm0, %v1448_v0  ;;  %v689_v59 = vmul.f32 %v1288_v56, %v1272_v29 }
 0x3df   : > { %1161 = vmatprep.subr.bf16.mxu0 %v1448_v0 }
 0x3e0   : > { %v1290_v60 = vpop.eup %1289  ;;  %v690_v61 = vpack.c.bf16 %v689_v59, %v687_v58 }
 0x3e1   : > { %v1292_v62 = vpop.eup %1291  ;;  %v827_v1 = vmul.f32 %v1290_v60, %v1703_v30 }
 0x3e2   : > { %v829_v2 = vmul.f32 %v1292_v62, %v1276_v33 }
 0x3e4   : > { %v830_v3 = vpack.c.bf16 %v829_v2, %v827_v1 }
 0x3e5   : > { %1152 = vmatmul.mubr.msk.bf16.vlgmr.msra.gmra.mxu0 %vm396_vm4, %v690_v61 }
 0x3e6   : > { %1162 = vmatpush3.bf16.msra.mxu0 %v832_v63  ;;  %1163 = vmatprep.mubr.msk.bf16.mxu0 %vm1449_vm0, %v1448_v0 }
 0x3ed   : > { %1164 = vmatmul.mubr.msk.bf16.vlgmr.msra.gmra.mxu0 %vm396_vm4, %v830_v3 }
 0x468   : > { %v460_v4 = vpop.f32.mrf.mxu0 }
 0x469   : > { %467 = vst.msk [vmem:[#allocation3] sm:$0xff] %vm348_vm3, %v460_v4 }
 0x46a   : > { %v1129_v5 = vpop.f32.mrf.mxu0 }
 0x46c   : > { %v463_v6 = vpop.f32.mrf.mxu0 }
 0x46d   : > { %468 = vst.msk [vmem:[#allocation3 + $0x8] sm:$0xff] %vm348_vm3, %v463_v6 }
 0x46e   : > { %v1130_v7 = vpop.f32.mrf.mxu0 }
 0x49d   : > { %v591_v8 = vpop.f32.mrf.mxu0 }
 0x49e   : > { %600 = vrot.lane.b32.xlu1 %v591_v8, %s1461_s13 }
 0x49f   : > { %v1141_v9 = vpop.f32.mrf.mxu0 }
 0x4a1   : > { %v594_v10 = vpop.f32.mrf.mxu0 }
 0x4a2   : > { %602 = vrot.lane.b32.xlu0 %v594_v10, %s1461_s13 }
 0x4a3   : > { %v1142_v11 = vpop.f32.mrf.mxu0 }
 0x4a5   : > { %v731_v12 = vpop.f32.mrf.mxu0 }
 0x4a6   : > { %740 = vrot.lane.b32.xlu1 %v731_v12, %s1462_s24 }
 0x4a7   : > { %v1153_v18 = vpop.f32.mrf.mxu0 }
 0x4a9   : > { %v734_v21 = vpop.f32.mrf.mxu0 }
 0x4aa   : > { %742 = vrot.lane.b32.xlu0 %v734_v21, %s1462_s24 }
 0x4ab   : > { %v1154_v22 = vpop.f32.mrf.mxu0 }
 0x4ad   : > { %v871_v23 = vpop.f32.mrf.mxu0 }
 0x4ae   : > { %880 = vrot.lane.b32.xlu1 %v871_v23, %s1463_s26 }
 0x4af   : > { %v1165_v24 = vpop.f32.mrf.mxu0 }
 0x4b1   : > { %v874_v25 = vpop.f32.mrf.mxu0 }
 0x4b2   : > { %882 = vrot.lane.b32.xlu0 %v874_v25, %s1463_s26 }
 0x4b3   : > { %v1166_v26 = vpop.f32.mrf.mxu0 }
 0x510   : > { %v601_v27 = vpop.permute.xlu1 %600 }
 0x511   : > { %607 = vst.msk [vmem:[#allocation3] sm:$0xff] %vm606_vm5, %v601_v27 }
 0x514   : > { %v603_v28 = vpop.permute.xlu0 %602 }
 0x515   : > { %608 = vst.msk [vmem:[#allocation3 + $0x8] sm:$0xff] %vm606_vm5, %v603_v28 }
 0x518   : > { %v741_v29 = vpop.permute.xlu1 %740 }
 0x519   : > { %747 = vst.msk [vmem:[#allocation3] sm:$0xff] %vm746_vm6, %v741_v29 }
 0x51c   : > { %v743_v0 = vpop.permute.xlu0 %742 }
 0x51d   : > { %748 = vst.msk [vmem:[#allocation3 + $0x8] sm:$0xff] %vm746_vm6, %v743_v0 }
 0x520   : > { %v881_v30 = vpop.permute.xlu1 %880 }
 0x521   : > { %887 = vst.msk [vmem:[#allocation3] sm:$0xff] %vm886_vm7, %v881_v30 }
 0x524   : > { %v883_v31 = vpop.permute.xlu0 %882 }
 0x525   : > { %888 = vst.msk [vmem:[#allocation3 + $0x8] sm:$0xff] %vm886_vm7, %v883_v31 }
 0x528   : > { %v889_v32 = vld [vmem:[#allocation3] sm:$0xff] }
 0x52c   : > { %v890_v33 = vld [vmem:[#allocation3 + $0x8] sm:$0xff] }
 0x52d   : > { %v891_v34 = vpack.c.bf16 %v890_v33, %v889_v32 }
 0x52f   : > { %1172 = vmatmul.mubr.msk.bf16.vlgmr.msra.gmra.mxu1 %vm291_vm1, %v891_v34 }
 0x5ef   : > { %v942_v36 = vpop.f32.mrf.mxu1 }
 0x5f0   : > { %v943_v37 = vadd.f32 %v1080_v35, %v942_v36 }
 0x5f1   : > { %v1173_v38 = vpop.f32.mrf.mxu1 }
 0x5f2   : > { %949 = vst.msk [vmem:[%s271_s12] sm:$0xff] %vm291_vm1, %v943_v37 }
 0x5f3   : > { %v945_v39 = vpop.f32.mrf.mxu1 }
 0x5f4   : > { %v946_v40 = vadd.f32 %v1080_v35, %v945_v39 }
 0x5f5   : > { %v1174_v41 = vpop.f32.mrf.mxu1 }
 0x5f6   : > { %950 = vst.msk [vmem:[%s271_s12 + $0x8] sm:$0xff] %vm291_vm1, %v946_v40 }
 0x5f7   : > { %1386 = shalt.err (!%p1383_p3)
}
 0x5f8   : > { %s1387_s24 = scalar_lea.hbm %s1745_s11, 256  ;;  %s1391_s10 = scalar_lea.hbm %s1795_s5, 512 }
 0x5f9   : > { %p1388_p11 = scmp.ne.s32.totalorder %s1745_s11, %s1387_s24  ;;  %p1392_p4 = scmp.lt.s32.totalorder %s1745_s11, %s1795_s5 }
 0x5fa   : > { %p1393_p6 = scmp.lt.s32.totalorder %s1391_s10, %s1387_s24 }
 0x5fb   : > { %p1389_p9 = pnand %p1388_p11, %p1812_p2 }
 0x5fc   : > { %p1394_p8 = por %p1393_p6, %p1392_p4 }
 0x5fd   : > { %p1390_p1 = pneg %p1389_p9 }
 0x5ff   : > { %p1395_p5 = pnand %p1394_p8, %p1390_p1 }
 0x601   : > { %1398 = shalt.err (!%p1395_p5)
}
 0x602   : > { %s1465_s7 = smov 128  }
 0x603   : > { %1185 = dma.vmem_to_hbm [thread:$0]  (%p1812_p2), %s1740_s14, 256, %s1745_s11, %s952_s8, %s1465_s7, %s1465_s7, %s1461_s13  }
 0x604 PF: > { %s980_s28 = sand.u32 1, %s1429_s18   ;;  %p1813_p7 = scmp.ne.s32.totalorder %s1802_s25, 0 }
 0x605   : > { %p1814_p12 = scmp.ge.s32.totalorder %s1441_s21, 2  ;;  %s981_s17 = scalar_lea.sflag [#allocation6], %s980_s28 }
 0x607   : > { %p1199_p13 = pnand %p1814_p12, %p1813_p7 }
 0x609   : > { %p1200_p0 = pneg %p1199_p13 }
 0x60b   : > { %1424 = dma.done.wait (%p1200_p0), %s981_s17, 256  }
 0x60c   : > { %1426 = vsyncadd (%p1200_p0), %s981_s17, 4294967040  ;;  %p19_p10 = scmp.ge.s32.totalorder %s1574_s15, 4   ;;  %s1815_s18 = smov %s1433_s19 }
 0x60d   : > { %s1816_s19 = smov %s1437_s20  ;;  %s1817_s20 = smov %s1590_s27 }
 0x60e   : > { %s1818_s21 = smov %s1574_s15  ;;  %21 = sbr.rel (!%p19_p10) target bundleno = 6 (0x6), region = 93 }
 0x613   :  { %986 = vsyncpa [#allocation5], 1 }
 0x614   :  { %988 = vsyncpa [#allocation5 + $0x1], 1 }
 0x615   :  { %989 = vsyncpa [#allocation8], 1 }
 0x616   :  { %990 = vsyncpa [#allocation6], 1 }
 0x617   :  { %992 = vsyncpa [#allocation6 + $0x1], 1 }

</bundles_post_ra>
